<compile_context>
chip_gen: v6e
topology: v6e:2x2x1
jax: 0.10.0
libtpu: 0.0.40
codegen_flags: <defaults>
</compile_context>

<pallas_src>
import functools

import jax
import jax.numpy as jnp
from jax.experimental import pallas as pl
from jax.experimental.pallas import tpu as pltpu


def gated_moe_kernel(x_ref, w1_ref, b1_ref, w2_ref, b2_ref, out_ref,
                     *, n_experts, d_in):
    # x_ref:  (TB, N*D)  experts-major / feature-minor (== torch .view(B, N*D))
    # w1_ref: (N*D, H), b1_ref: (1, H), w2_ref: (H, N), b2_ref: (1, N)
    # out_ref: (TB, D)
    x2d = x_ref[...]

    # Gate MLP: Linear -> ReLU -> Linear -> Softmax(dim=-1)
    h = jnp.dot(x2d, w1_ref[...], preferred_element_type=jnp.float32) + b1_ref[...]
    h = jnp.maximum(h, 0.0)
    logits = jnp.dot(h, w2_ref[...], preferred_element_type=jnp.float32) + b2_ref[...]

    logits = logits - jnp.max(logits, axis=-1, keepdims=True)
    e = jnp.exp(logits)
    inv_denom = pl.reciprocal(jnp.sum(e, axis=-1, keepdims=True), approx=True)
    gate = e * inv_denom                                   # (TB, N)

    # Weighted sum over experts: out[b, d] = sum_n gate[b, n] * xs[b, n, d].
    # N is tiny (4): unrolled broadcast-multiply-adds on the VPU, slicing the
    # already-loaded flattened tile so xs is never re-touched in a second layout.
    acc = gate[:, 0:1] * x2d[:, 0:d_in]
    for n in range(1, n_experts):
        acc = acc + gate[:, n:n + 1] * x2d[:, n * d_in:(n + 1) * d_in]
    out_ref[...] = acc.astype(out_ref.dtype)


def gated_moe(xs_stacked, w1, b1, w2, b2, *, tb=512):
    B, N, D = xs_stacked.shape
    H = w1.shape[1]

    # Layout plumbing in the wrapper (not per-tile inside the kernel).
    x2d = xs_stacked.reshape(B, N * D)

    # Batch tile: multiple of 8, capped at `tb` (512 keeps well under the v7x
    # 32 MiB scoped-VMEM budget even with double-buffered in/out blocks).
    TB = max(8, min(tb, ((B + 7) // 8) * 8))
    B_pad = pl.cdiv(B, TB) * TB
    if B_pad != B:
        x2d = jnp.pad(x2d, ((0, B_pad - B), (0, 0)))

    kernel = functools.partial(gated_moe_kernel, n_experts=N, d_in=D)

    out = pl.pallas_call(
        kernel,
        out_shape=jax.ShapeDtypeStruct((B_pad, D), xs_stacked.dtype),
        grid=(B_pad // TB,),
        in_specs=[
            pl.BlockSpec((TB, N * D), lambda i: (i, 0)),     # streamed batch tile
            pl.BlockSpec((N * D, H), lambda i: (0, 0)),      # VMEM-resident weights
            pl.BlockSpec((1, H), lambda i: (0, 0)),
            pl.BlockSpec((H, N), lambda i: (0, 0)),
            pl.BlockSpec((1, N), lambda i: (0, 0)),
        ],
        out_specs=pl.BlockSpec((TB, D), lambda i: (i, 0)),
        compiler_params=pltpu.CompilerParams(
            dimension_semantics=("parallel",)),
    )(x2d, w1, b1, w2, b2)
    return out[:B]


def reference(xs_stacked, w1, b1, w2, b2):
    B, N, D = xs_stacked.shape
    x2d = xs_stacked.reshape(B, N * D)
    h = jnp.maximum(x2d @ w1 + b1, 0.0)
    w = jax.nn.softmax(h @ w2 + b2, axis=-1)
    return jnp.einsum("bn,bnd->bd", w, xs_stacked)


if __name__ == "__main__":
    # Small shapes consistent with the module: d_in=32, n_e=4 experts, d_h=64, batch=8
    B, D, N, H = 8, 32, 4, 64

    key = jax.random.PRNGKey(0)
    k_xs, k_w1, k_b1, k_w2, k_b2 = jax.random.split(key, 5)

    # the module's forward takes a list of N tensors of shape (B, D)
    xs_list = [
        jax.random.normal(jax.random.fold_in(k_xs, i), (B, D), dtype=jnp.float32)
        for i in range(N)
    ]
    xs_stacked = jnp.stack(xs_list, axis=1)        # (B, N, D)

    # deterministic gate parameters (Linear(d_in*n_e, d_h), Linear(d_h, n_e)),
    # stored as (in, out) so matmuls are x @ W + b.
    w1 = jax.random.normal(k_w1, (N * D, H), dtype=jnp.float32) * 0.05
    b1 = jax.random.normal(k_b1, (1, H), dtype=jnp.float32) * 0.05
    w2 = jax.random.normal(k_w2, (H, N), dtype=jnp.float32) * 0.05
    b2 = jax.random.normal(k_b2, (1, N), dtype=jnp.float32) * 0.05

    out = gated_moe(xs_stacked, w1, b1, w2, b2)
    out = jax.block_until_ready(out)

    ref = reference(xs_stacked, w1, b1, w2, b2)
    assert out.shape == (B, D)
    # Slightly looser tolerance because the softmax denominator uses the EUP
    # approximate reciprocal (pl.reciprocal(..., approx=True)).
    assert jnp.allclose(out, ref, atol=2e-3, rtol=2e-3), (
        float(jnp.max(jnp.abs(out - ref))))

    print("KERNEL_OK")
</pallas_src>

<mosaic_0001>
module attributes {stable_mosaic.version = 11 : i64} {
  func.func @gated_moe_kernel(%arg0: i32, %arg1: memref<8x128xf32, #tpu.memory_space<vmem>>, %arg2: memref<128x64xf32, #tpu.memory_space<vmem>>, %arg3: memref<1x64xf32, #tpu.memory_space<vmem>>, %arg4: memref<64x4xf32, #tpu.memory_space<vmem>>, %arg5: memref<1x4xf32, #tpu.memory_space<vmem>>, %arg6: memref<8x32xf32, #tpu.memory_space<vmem>>) attributes {dimension_semantics = [#tpu.dimension_semantics<parallel>], iteration_bounds = array<i64: 1>, scalar_prefetch = 0 : i64, scratch_operands = 0 : i64, tpu.core_type = #tpu.core_type<tc>, window_params = [{transform_indices = @transform_0, window_bounds = array<i64: 8, 128>}, {pipeline_mode = #tpu.pipeline_mode<synchronous>, transform_indices = @transform_1, window_bounds = array<i64: 128, 64>}, {pipeline_mode = #tpu.pipeline_mode<synchronous>, transform_indices = @transform_2, window_bounds = array<i64: 1, 64>}, {pipeline_mode = #tpu.pipeline_mode<synchronous>, transform_indices = @transform_3, window_bounds = array<i64: 64, 4>}, {pipeline_mode = #tpu.pipeline_mode<synchronous>, transform_indices = @transform_4, window_bounds = array<i64: 1, 4>}, {transform_indices = @transform_5, window_bounds = array<i64: 8, 32>}]} {
    %c0 = arith.constant 0 : index
    %c0_0 = arith.constant 0 : index
    %0 = vector.load %arg1[%c0, %c0_0] : memref<8x128xf32, #tpu.memory_space<vmem>>, vector<8x128xf32>
    %c0_1 = arith.constant 0 : index
    %c0_2 = arith.constant 0 : index
    %1 = vector.load %arg2[%c0_1, %c0_2] : memref<128x64xf32, #tpu.memory_space<vmem>>, vector<128x64xf32>
    %cst = arith.constant dense<0.000000e+00> : vector<8x64xf32>
    %2 = tpu.matmul %0, %1, %cst {dimension_numbers = #tpu.dot_dimension_numbers<[1], [0], [0], [1], [0, 0, 1, 1], [], []>} : vector<8x128xf32>, vector<128x64xf32>, vector<8x64xf32> -> vector<8x64xf32>
    %c0_3 = arith.constant 0 : index
    %c0_4 = arith.constant 0 : index
    %3 = vector.load %arg3[%c0_3, %c0_4] : memref<1x64xf32, #tpu.memory_space<vmem>>, vector<1x64xf32>
    %4 = vector.broadcast %3 : vector<1x64xf32> to vector<8x64xf32>
    %5 = arith.addf %2, %4 : vector<8x64xf32>
    %cst_5 = arith.constant 0.000000e+00 : f32
    %6 = vector.broadcast %cst_5 : f32 to vector<8x64xf32>
    %7 = arith.maximumf %5, %6 : vector<8x64xf32>
    %c0_6 = arith.constant 0 : index
    %c0_7 = arith.constant 0 : index
    %8 = vector.load %arg4[%c0_6, %c0_7] : memref<64x4xf32, #tpu.memory_space<vmem>>, vector<64x4xf32>
    %cst_8 = arith.constant dense<0.000000e+00> : vector<8x4xf32>
    %9 = tpu.matmul %7, %8, %cst_8 {dimension_numbers = #tpu.dot_dimension_numbers<[1], [0], [0], [1], [0, 0, 1, 1], [], []>} : vector<8x64xf32>, vector<64x4xf32>, vector<8x4xf32> -> vector<8x4xf32>
    %c0_9 = arith.constant 0 : index
    %c0_10 = arith.constant 0 : index
    %10 = vector.load %arg5[%c0_9, %c0_10] : memref<1x4xf32, #tpu.memory_space<vmem>>, vector<1x4xf32>
    %11 = vector.broadcast %10 : vector<1x4xf32> to vector<8x4xf32>
    %12 = arith.addf %9, %11 : vector<8x4xf32>
    %cst_11 = arith.constant dense<0xFF800000> : vector<8xf32>
    %13 = vector.multi_reduction <maximumf>, %12, %cst_11 [1] : vector<8x4xf32> to vector<8xf32>
    %14 = vector.shape_cast %13 : vector<8xf32> to vector<8x1xf32>
    %15 = vector.broadcast %14 : vector<8x1xf32> to vector<8x4xf32>
    %16 = arith.subf %12, %15 : vector<8x4xf32>
    %17 = math.exp %16 : vector<8x4xf32>
    %cst_12 = arith.constant dense<0.000000e+00> : vector<8xf32>
    %18 = vector.multi_reduction <add>, %17, %cst_12 [1] : vector<8x4xf32> to vector<8xf32>
    %19 = vector.shape_cast %18 : vector<8xf32> to vector<8x1xf32>
    %20 = tpu.reciprocal %19 {approx = true} : vector<8x1xf32> -> vector<8x1xf32>
    %21 = vector.broadcast %20 : vector<8x1xf32> to vector<8x4xf32>
    %22 = arith.mulf %17, %21 : vector<8x4xf32>
    %23 = vector.extract_strided_slice %22 {offsets = [0, 0], sizes = [8, 1], strides = [1, 1]} : vector<8x4xf32> to vector<8x1xf32>
    %24 = vector.extract_strided_slice %0 {offsets = [0, 0], sizes = [8, 32], strides = [1, 1]} : vector<8x128xf32> to vector<8x32xf32>
    %25 = vector.broadcast %23 : vector<8x1xf32> to vector<8x32xf32>
    %26 = arith.mulf %25, %24 : vector<8x32xf32>
    %27 = vector.extract_strided_slice %22 {offsets = [0, 1], sizes = [8, 1], strides = [1, 1]} : vector<8x4xf32> to vector<8x1xf32>
    %28 = vector.extract_strided_slice %0 {offsets = [0, 32], sizes = [8, 32], strides = [1, 1]} : vector<8x128xf32> to vector<8x32xf32>
    %29 = vector.broadcast %27 : vector<8x1xf32> to vector<8x32xf32>
    %30 = arith.mulf %29, %28 : vector<8x32xf32>
    %31 = arith.addf %26, %30 : vector<8x32xf32>
    %32 = vector.extract_strided_slice %22 {offsets = [0, 2], sizes = [8, 1], strides = [1, 1]} : vector<8x4xf32> to vector<8x1xf32>
    %33 = vector.extract_strided_slice %0 {offsets = [0, 64], sizes = [8, 32], strides = [1, 1]} : vector<8x128xf32> to vector<8x32xf32>
    %34 = vector.broadcast %32 : vector<8x1xf32> to vector<8x32xf32>
    %35 = arith.mulf %34, %33 : vector<8x32xf32>
    %36 = arith.addf %31, %35 : vector<8x32xf32>
    %37 = vector.extract_strided_slice %22 {offsets = [0, 3], sizes = [8, 1], strides = [1, 1]} : vector<8x4xf32> to vector<8x1xf32>
    %38 = vector.extract_strided_slice %0 {offsets = [0, 96], sizes = [8, 32], strides = [1, 1]} : vector<8x128xf32> to vector<8x32xf32>
    %39 = vector.broadcast %37 : vector<8x1xf32> to vector<8x32xf32>
    %40 = arith.mulf %39, %38 : vector<8x32xf32>
    %41 = arith.addf %36, %40 : vector<8x32xf32>
    %c0_13 = arith.constant 0 : index
    %c0_14 = arith.constant 0 : index
    %42 = vector.load %arg6[%c0_13, %c0_14] : memref<8x32xf32, #tpu.memory_space<vmem>>, vector<8x32xf32>
    tpu.vector_store %arg6[%c0_13, %c0_14], %41 {strides = array<i32>} : memref<8x32xf32, #tpu.memory_space<vmem>>, vector<8x32xf32>,
    return
  }
  func.func @transform_0(%arg0: i32) -> (i32, i32) {
    %c0_i32 = arith.constant 0 : i32
    %c0_i32_0 = arith.constant 0 : i32
    return %arg0, %c0_i32 : i32, i32
  }
  func.func @transform_1(%arg0: i32) -> (i32, i32) {
    %c0_i32 = arith.constant 0 : i32
    %c0_i32_0 = arith.constant 0 : i32
    %c0_i32_1 = arith.constant 0 : i32
    return %c0_i32, %c0_i32_0 : i32, i32
  }
  func.func @transform_2(%arg0: i32) -> (i32, i32) {
    %c0_i32 = arith.constant 0 : i32
    %c0_i32_0 = arith.constant 0 : i32
    %c0_i32_1 = arith.constant 0 : i32
    return %c0_i32, %c0_i32_0 : i32, i32
  }
  func.func @transform_3(%arg0: i32) -> (i32, i32) {
    %c0_i32 = arith.constant 0 : i32
    %c0_i32_0 = arith.constant 0 : i32
    %c0_i32_1 = arith.constant 0 : i32
    return %c0_i32, %c0_i32_0 : i32, i32
  }
  func.func @transform_4(%arg0: i32) -> (i32, i32) {
    %c0_i32 = arith.constant 0 : i32
    %c0_i32_0 = arith.constant 0 : i32
    %c0_i32_1 = arith.constant 0 : i32
    return %c0_i32, %c0_i32_0 : i32, i32
  }
  func.func @transform_5(%arg0: i32) -> (i32, i32) {
    %c0_i32 = arith.constant 0 : i32
    %c0_i32_0 = arith.constant 0 : i32
    return %arg0, %c0_i32 : i32, i32
  }
}

</mosaic_0001>

<bundles_post_ra>
// kernel: tpu_custom_call.1
= control target key start
LH: loop header
LB: loop body
LE: loop exit
PB: predicated region body
PF: predicated region fallthrough
CT: control target
= control target key end

     0   :  { %v392_v1 = vmov 0.0   ;;  %vm393_vm0 = vmmov 0   ;;  %s549_s0 = inlined_call_operand.vmem [shape: f32[8,128], index: 0, kind: input, shape index: {}]   ;;  %s550_s1 = inlined_call_operand.vmem [shape: f32[128,64], index: 1, kind: input, shape index: {}]   ;;  %s551_s2 = inlined_call_operand.vmem [shape: f32[1,64], index: 2, kind: input, shape index: {}]   ;;  %s552_s3 = inlined_call_operand.vmem [shape: f32[64,4], index: 3, kind: input, shape index: {}]   ;;  %s553_s4 = inlined_call_operand.vmem [shape: f32[1,4], index: 4, kind: input, shape index: {}]   ;;  %s554_s5 = inlined_call_operand.hbm [shape: f32[8,32], index: 5, kind: output, shape index: {}]  }
   0x1   :  { %v37_v0 = vld [vmem:[%s550_s1 + $0x78] sm:$0xff]  ;;  %298 = vmatprep.subr.mxu0 %v392_v1  ;;  %v36_v2 = vld [vmem:[%s550_s1 + $0x70] sm:$0xff]  ;;  %330 = vmatprep.mubr.msk.f32.mxu0 %vm393_vm0, %v392_v1  ;;  %v35_v3 = vld [vmem:[%s550_s1 + $0x68] sm:$0xff] }
   0x2   :  { %299 = vmatpush3.msra.mxu0 %v37_v0  ;;  %333 = vmatprep.subr.mxu1 %v392_v1  ;;  %v34_v4 = vld [vmem:[%s550_s1 + $0x60] sm:$0xff]  ;;  %v123_v5 = vld [vmem:[%s552_s3 + $0x38] sm:$0xff]  ;;  %v122_v6 = vld [vmem:[%s552_s3 + $0x30] sm:$0xff] }
   0x3   :  { %300 = vmatprep.subr.mxu0 %v392_v1  ;;  %349 = vmatprep.mubr.msk.f32.mxu1 %vm393_vm0, %v392_v1  ;;  %v33_v7 = vld [vmem:[%s550_s1 + $0x58] sm:$0xff]  ;;  %v121_v8 = vld [vmem:[%s552_s3 + $0x28] sm:$0xff] }
   0x4   :  { %301 = vmatpush3.msra.mxu0 %v36_v2  ;;  %334 = vmatpush3.msra.mxu1 %v123_v5 }
   0x5   :  { %302 = vmatprep.subr.mxu0 %v392_v1  ;;  %335 = vmatprep.subr.mxu1 %v392_v1 }
   0x6   :  { %303 = vmatpush3.msra.mxu0 %v35_v3 }
   0x7   :  { %304 = vmatprep.subr.mxu0 %v392_v1 }
   0x8   :  { %10 = vsyncpa [#allocation3], 0  ;;  %305 = vmatpush3.msra.mxu0 %v34_v4  ;;  %336 = vmatpush3.msra.mxu1 %v122_v6  ;;  %v32_v9 = vld [vmem:[%s550_s1 + $0x50] sm:$0xff]  ;;  %v120_v10 = vld [vmem:[%s552_s3 + $0x20] sm:$0xff]  ;;  %vm131_vm1 = vcmask 523264   ;;  %vm205_vm2 = vcmask 31744  }
   0x9   :  { %306 = vmatprep.subr.mxu0 %v392_v1  ;;  %337 = vmatprep.subr.mxu1 %v392_v1  ;;  %v31_v11 = vld [vmem:[%s550_s1 + $0x48] sm:$0xff]  ;;  %v119_v12 = vld [vmem:[%s552_s3 + $0x18] sm:$0xff]  ;;  %v30_v13 = vld [vmem:[%s550_s1 + $0x40] sm:$0xff]  ;;  %v394_v41 = vmov 3   ;;  %v395_v42 = vmov 1   ;;  %v396_v46 = vmov 2  }
   0xa   :  { %307 = vmatpush3.msra.mxu0 %v33_v7  ;;  %338 = vmatpush3.msra.mxu1 %v121_v8  ;;  %v29_v14 = vld [vmem:[%s550_s1 + $0x38] sm:$0xff]  ;;  %v28_v15 = vld [vmem:[%s550_s1 + $0x30] sm:$0xff]  ;;  %v27_v16 = vld [vmem:[%s550_s1 + $0x28] sm:$0xff]  ;;  %v397_v47 = vmov 0   ;;  %s401_s20 = smov [#allocation2]   ;;  %vm253_vm3 = vcmask 261120  }
   0xb   :  { %308 = vmatprep.subr.mxu0 %v392_v1  ;;  %339 = vmatprep.subr.mxu1 %v392_v1  ;;  %v26_v17 = vld [vmem:[%s550_s1 + $0x20] sm:$0xff]  ;;  %v25_v18 = vld [vmem:[%s550_s1 + $0x18] sm:$0xff]  ;;  %v24_v19 = vld [vmem:[%s550_s1 + $0x10] sm:$0xff]  ;;  %s261_s21 = sshll.u32 %s401_s20, 4  ;;  %s262_s21 = int_to_ptr.vmem [resolvable:$true] %s261_s21 }
   0xc   :  { %309 = vmatpush3.msra.mxu0 %v32_v9  ;;  %340 = vmatpush3.msra.mxu1 %v120_v10  ;;  %v23_v20 = vld [vmem:[%s550_s1 + $0x8] sm:$0xff]  ;;  %v22_v21 = vld [vmem:[%s550_s1] sm:$0xff]  ;;  %v118_v23 = vld [vmem:[%s552_s3 + $0x10] sm:$0xff]  ;;  %s370_s22 = scalar_lea.vmem %s262_s21, 128  ;;  %p375_p1 = scmp.lt.s32.totalorder %s262_s21, %s262_s21 }
   0xd   :  { %310 = vmatprep.subr.mxu0 %v392_v1  ;;  %341 = vmatprep.subr.mxu1 %v392_v1  ;;  %v521_v22 = vld [vmem:[%s549_s0] sm:$0xff]  ;;  %v117_v24 = vld [vmem:[%s552_s3 + $0x8] sm:$0xff]  ;;  %p371_p0 = scmp.ne.s32.totalorder %s262_s21, %s370_s22  ;;  %p376_p2 = scmp.lt.s32.totalorder %s370_s22, %s370_s22 }
   0xe   :  { %311 = vmatpush3.msra.mxu0 %v31_v11  ;;  %342 = vmatpush3.msra.mxu1 %v119_v12  ;;  %v116_v25 = vld [vmem:[%s552_s3] sm:$0xff]  ;;  %s399_s3 = smov 64  }
   0xf   :  { %312 = vmatprep.subr.mxu0 %v392_v1  ;;  %343 = vmatprep.subr.mxu1 %v392_v1  ;;  %v269_v26 = vld [vmem:[%s551_s2] ss:$0 sm:$0xff]  ;;  %s398_s2 = smov 96   ;;  %p377_p3 = por %p376_p2, %p375_p1 }
  0x10   :  { %313 = vmatpush3.msra.mxu0 %v30_v13  ;;  %344 = vmatpush3.msra.mxu1 %v118_v23  ;;  %v270_v31 = vld [vmem:[%s553_s4] ss:$0 sm:$0xff]  ;;  %s400_s4 = smov 32  }
  0x11   :  { %314 = vmatprep.subr.mxu0 %v392_v1  ;;  %345 = vmatprep.subr.mxu1 %v392_v1  ;;  %p378_p4 = pnand %p377_p3, %p371_p0 }
  0x12   :  { %315 = vmatpush3.msra.mxu0 %v29_v14  ;;  %346 = vmatpush3.msra.mxu1 %v117_v24 }
  0x13   :  { %316 = vmatprep.subr.mxu0 %v392_v1  ;;  %347 = vmatprep.subr.mxu1 %v392_v1 }
  0x14   :  { %317 = vmatpush3.msra.mxu0 %v28_v15  ;;  %348 = vmatpush3.msra.mxu1 %v116_v25 }
  0x15   :  { %318 = vmatprep.subr.mxu0 %v392_v1  ;;  %364 = vset.pattern.permute.xlu0 %v394_v41 }
  0x16   :  { %319 = vmatpush3.msra.mxu0 %v27_v16  ;;  %362 = vset.pattern.permute.xlu1 %v395_v42 }
  0x17   :  { %320 = vmatprep.subr.mxu0 %v392_v1 }
  0x18   :  { %321 = vmatpush3.msra.mxu0 %v26_v17 }
  0x19   :  { %322 = vmatprep.subr.mxu0 %v392_v1 }
  0x1a   :  { %323 = vmatpush3.msra.mxu0 %v25_v18 }
  0x1b   :  { %324 = vmatprep.subr.mxu0 %v392_v1 }
  0x1c   :  { %325 = vmatpush3.msra.mxu0 %v24_v19 }
  0x1d   :  { %326 = vmatprep.subr.mxu0 %v392_v1 }
  0x1e   :  { %327 = vmatpush3.msra.mxu0 %v23_v20 }
  0x1f   :  { %328 = vmatprep.subr.mxu0 %v392_v1 }
  0x20   :  { %329 = vmatpush3.msra.mxu0 %v22_v21 }
  0x21   :  { %331 = vmatmul.mubr.f32.vlgmr.msra.gmra.mxu0 %v521_v22 }
  0xe1   :  { %v111_v27 = vpop.f32.mrf.mxu0 }
  0xe2   :  { %v112_v28 = vadd.f32 %v269_v26, %v111_v27 }
  0xe3   :  { %v332_v29 = vpop.f32.mrf.mxu0 }
  0xe4   :  { %v115_v30 = vmax.f32 %v112_v28, 0.0 }
  0xe6   :  { %350 = vmatmul.mubr.msk.f32.vlgmr.msra.gmra.mxu1 %vm131_vm1, %v115_v30 }
 0x1a6   :  { %v201_v32 = vpop.f32.mrf.mxu1 }
 0x1a7   :  { %v202_v33 = vadd.f32 %v270_v31, %v201_v32 }
 0x1a8   :  { %v351_v34 = vpop.f32.mrf.mxu1 }
 0x1a9   :  { %v206_v35 = vsel %vm205_vm2, %v202_v33, -inf }
 0x1aa   :  { %207 = vmax.xlane.f32.xlu0 %v206_v35 }
 0x233   :  { %v208_v36 = vpop.xlane.xlu0 %207 }
 0x234   :  { %v209_v37 = vsub.f32 %v202_v33, %v208_v36 }
 0x236   :  { %v210_v38 = vmul.f32 1.442695, %v209_v37 }
 0x238   :  { %366 = vpow2.f32 %v210_v38 }
 0x245   :  { %v367_v39 = vpop.eup %366 }
 0x246   :  { %v212_v40 = vsel %vm205_vm2, %v367_v39, 0.0 }
 0x247   :  { %213 = vadd.xlane.f32.xlu0 %v212_v40 }
 0x2d0   :  { %v214_v43 = vpop.xlane.xlu0 %213 }
 0x2d1   :  { %368 = vrcp.f32 %v214_v43 }
 0x2de   :  { %v369_v44 = vpop.eup %368 }
 0x2df   :  { %v216_v45 = vmul.f32 %v369_v44, %v367_v39 }
 0x2e1   :  { %244 = vperm.xlu0 %364, %v216_v45   ;;  %224 = vperm.xlu1 %362, %v216_v45  }
 0x2e5   :  { %363 = vset.pattern.permute.xlu1 %v396_v46 }
 0x2e6   :  { %234 = vperm.xlu1 %363, %v216_v45  }
 0x2ea   :  { %365 = vset.pattern.permute.xlu1 %v397_v47 }
 0x2eb   :  { %219 = vperm.xlu1 %365, %v216_v45  }
 0x35c   :  { %v225_v48 = vpop.permute.xlu1 %224  ;;  %v245_v52 = vpop.permute.xlu0 %244 }
 0x35d   :  { %v227_v49 = vmul.f32 %v225_v48, %v521_v22  ;;  %v247_v53 = vmul.f32 %v245_v52, %v521_v22 }
 0x35f   :  { %229 = vrot.lane.b32.xlu1 %v227_v49, %s398_s2 }
 0x361   :  { %v235_v50 = vpop.permute.xlu1 %234 }
 0x362   :  { %v237_v51 = vmul.f32 %v235_v50, %v521_v22 }
 0x364   :  { %239 = vrot.lane.b32.xlu1 %v237_v51, %s399_s3 }
 0x366   :  { %v220_v54 = vpop.permute.xlu1 %219 }
 0x367   :  { %v222_v56 = vmul.f32 %v220_v54, %v521_v22 }
 0x368   :  { %249 = vrot.lane.b32.xlu1 %v247_v53, %s400_s4 }
 0x3d1   :  { %v230_v55 = vpop.permute.xlu1 %229 }
 0x3d2   :  { %v232_v58 = vadd.f32 %v230_v55, %v222_v56 }
 0x3d6   :  { %v240_v57 = vpop.permute.xlu1 %239 }
 0x3d7   :  { %v242_v59 = vadd.f32 %v240_v57, %v232_v58 }
 0x3da   :  { %v250_v60 = vpop.permute.xlu1 %249 }
 0x3db   :  { %v252_v61 = vadd.f32 %v250_v60, %v242_v59 }
 0x3dd   :  { %254 = vst.msk [vmem:[#allocation2] sm:$0xff] %vm253_vm3, %v252_v61 }
 0x3de   :  { %381 = shalt.err (!%p378_p4)
}
 0x3df   :  { %264 = dma.vmem_to_hbm [thread:$0]  %s262_s21, 128, %s554_s5, [#allocation3]  }
 0x3e0   :  { %390 = dma.done.wait [#allocation3], 128  }
 0x3e1   :  { %391 = vsyncadd [#allocation3], 4294967168 }
 0x3e2   :  { %268 = vsyncpa [#allocation3], 1 }

</bundles_post_ra>
